<compile_context>
chip_gen: v7x
topology: tpu7x:2x2x1
jax: 0.10.0
libtpu: 0.0.40
codegen_flags: <defaults>
</compile_context>

<pallas_src>
import jax
import jax.numpy as jnp
from jax.experimental import pallas as pl
from jax.experimental.pallas import tpu as pltpu


def _blue_ocr_kernel(lhs_ref, w_ref, b_ref, o_ref):
    """One fused step: (RB, Kfp) x (Kfp, COp) matmul + bias, lane-dense store.

    lhs_ref: (RB, Kfp)  im2col rows for Bblk batch elements (RB = Bblk * P)
    w_ref  : (Kfp, COp) fused [w1; w3] weight, zero-padded (resident)
    b_ref  : (RB, COp)  per-row bias tile (row pattern [b1, b3, b3, ...] x Bblk)
    o_ref  : (RB, COp)  lane-dense output block
    """
    o_ref[...] = (
        jnp.dot(lhs_ref[...], w_ref[...], preferred_element_type=jnp.float32)
        + b_ref[...]
    ).astype(o_ref.dtype)


def _choose_batch_block(N, P, target_rows=512):
    """Pick elements-per-step: ~512 matmul rows, >=2 grid steps when possible,
    and rows-per-block a multiple of 8 (sublane-dense tiles)."""
    bblk = max(1, min(N, max(1, target_rows // P)))
    if N > 1 and bblk >= N:
        bblk = (N + 1) // 2          # keep >= 2 grid steps for v7x megacore
    while (bblk * P) % 8 != 0:
        bblk += 1
    return bblk


def blue_ocr_pallas(x, w1, b1, w3, b3):
    """x: (N, C, 1, W) NCHW; w1/w3: (35, C, 1, 6) OIHW; b1/b3: (35,).

    Returns (N, P, 35) matching
    torch.cat((conv1(x[..., :6]), conv3(x[..., 4:])), -1).squeeze(2).permute(0, 2, 1).
    """
    N, C, H, W = x.shape
    assert H == 1, "Blue_ocr forward implies a height-1 feature map (squeeze(2))"
    CO, Cw, KH, KW = w1.shape
    assert KH == 1 and KW == 6 and Cw == C and w3.shape == w1.shape

    STRIDE3 = 4
    W3 = W - 4
    Wo3 = (W3 + 2 - KW) // STRIDE3 + 1           # classifier3 output width
    assert Wo3 >= 1
    P = 1 + Wo3                                  # character positions per element

    KC = KW * C                                  # per-head contraction length
    Kf = 2 * KC                                  # fused (block-structured) K
    Kfp = ((Kf + 127) // 128) * 128              # lane-dense K
    COp = ((CO + 127) // 128) * 128              # lane-dense output channels

    # ---- wrapper-side im2col (fuses into one XLA pass over x) ----
    xs = jnp.transpose(x[:, :, 0, :], (0, 2, 1))                    # (N, W, C)
    win1 = xs[:, :KW, :].reshape(N, 1, KC)                          # head1 window
    x3p = jnp.pad(xs[:, 4:, :], ((0, 0), (1, 1), (0, 0)))           # (N, W3+2, C)
    win3 = jnp.stack(
        [x3p[:, STRIDE3 * k:STRIDE3 * k + KW, :] for k in range(Wo3)],
        axis=1).reshape(N, Wo3, KC)                                 # (N, Wo3, KC)

    z1 = jnp.zeros((N, 1, KC), x.dtype)
    z3 = jnp.zeros((N, Wo3, KC), x.dtype)
    lhs = jnp.concatenate(
        [jnp.concatenate([win1, z1], axis=-1),      # head1 row : [win | 0]
         jnp.concatenate([z3, win3], axis=-1)],     # head3 rows: [0 | win]
        axis=1)                                     # (N, P, Kf)
    if Kfp > Kf:
        lhs = jnp.pad(lhs, ((0, 0), (0, 0), (0, Kfp - Kf)))

    Bblk = _choose_batch_block(N, P)
    Npad = ((N + Bblk - 1) // Bblk) * Bblk
    if Npad > N:
        lhs = jnp.pad(lhs, ((0, Npad - N), (0, 0), (0, 0)))
    RB = Bblk * P                                   # rows per grid step (mult of 8)
    R = Npad * P
    lhs = lhs.reshape(R, Kfp)

    # ---- fused, block-structured weight (Kfp, COp) ----
    def flat_w(w):                                  # (CO, C, 1, KW) -> (KC, CO)
        return jnp.transpose(w[:, :, 0, :], (2, 1, 0)).reshape(KC, CO)

    wf = jnp.concatenate([flat_w(w1), flat_w(w3)], axis=0)          # (Kf, CO)
    wf = jnp.pad(wf, ((0, Kfp - Kf), (0, COp - CO)))                # (Kfp, COp)

    # per-row bias tile for one batch block (row 0 -> b1, rows 1..Wo3 -> b3)
    brow = jnp.concatenate(
        [jnp.pad(b1, (0, COp - CO)).reshape(1, COp),
         jnp.broadcast_to(jnp.pad(b3, (0, COp - CO)).reshape(1, COp),
                          (Wo3, COp))], axis=0)                     # (P, COp)
    btile = jnp.tile(brow, (Bblk, 1))                               # (RB, COp)

    out = pl.pallas_call(
        _blue_ocr_kernel,
        out_shape=jax.ShapeDtypeStruct((R, COp), x.dtype),
        grid_spec=pltpu.PrefetchScalarGridSpec(
            num_scalar_prefetch=0,
            grid=(R // RB,),
            in_specs=[
                # per-step im2col row block
                pl.BlockSpec((RB, Kfp), lambda i: (i, 0)),
                # fused weight and bias tile are resident (same block each step)
                pl.BlockSpec((Kfp, COp), lambda i: (0, 0)),
                pl.BlockSpec((RB, COp), lambda i: (0, 0)),
            ],
            out_specs=pl.BlockSpec((RB, COp), lambda i: (i, 0)),
        ),
        compiler_params=pltpu.CompilerParams(
            dimension_semantics=("parallel",)),
    )(lhs, wf, btile)

    # Drop batch padding and channel lane padding: (R, COp) -> (N, P, 35).
    return out.reshape(Npad, P, COp)[:N, :, :CO]


def _reference(x, w1, b1, w3, b3):
    """Pure-JAX (XLA) reference mirroring the PyTorch forward."""
    x1 = x[:, :, :, :6]
    x3 = x[:, :, :, 4:]
    out1 = jax.lax.conv_general_dilated(
        x1, w1, window_strides=(1, 1), padding=((0, 0), (0, 0)),
        dimension_numbers=("NCHW", "OIHW", "NCHW")) + b1.reshape(1, -1, 1, 1)
    out3 = jax.lax.conv_general_dilated(
        x3, w3, window_strides=(1, 4), padding=((0, 0), (1, 1)),
        dimension_numbers=("NCHW", "OIHW", "NCHW")) + b3.reshape(1, -1, 1, 1)
    out = jnp.concatenate([out1, out3], axis=-1)[:, :, 0, :]   # (N, CO, P)
    return jnp.transpose(out, (0, 2, 1))                       # (N, P, CO)


if __name__ == "__main__":
    # Small config consistent with Blue_ocr(in_channel=32) on a (N, C, 1, W)
    # OCR feature map.
    N, C_in, H, W = 2, 32, 1, 16
    CO, KW = 35, 6

    key = jax.random.PRNGKey(0)
    k_x, k_w1, k_b1, k_w3, k_b3 = jax.random.split(key, 5)
    x = jax.random.normal(k_x, (N, C_in, H, W), dtype=jnp.float32)
    w1 = jax.random.normal(k_w1, (CO, C_in, 1, KW), dtype=jnp.float32) * 0.1
    b1 = jax.random.normal(k_b1, (CO,), dtype=jnp.float32) * 0.1
    w3 = jax.random.normal(k_w3, (CO, C_in, 1, KW), dtype=jnp.float32) * 0.1
    b3 = jax.random.normal(k_b3, (CO,), dtype=jnp.float32) * 0.1

    out = blue_ocr_pallas(x, w1, b1, w3, b3)
    out = jax.block_until_ready(out)

    ref = _reference(x, w1, b1, w3, b3)
    Wo3 = ((W - 4) + 2 - KW) // 4 + 1
    P = 1 + Wo3
    assert out.shape == (N, P, CO), out.shape
    assert ref.shape == (N, P, CO), ref.shape
    assert jnp.allclose(out, ref, atol=1e-4, rtol=1e-4), "mismatch vs reference"

    print("KERNEL_OK")
</pallas_src>

<mosaic_0001>
module attributes {stable_mosaic.version = 11 : i64} {
  func.func @_blue_ocr_kernel(%arg0: i32, %arg1: memref<8x384xf32, #tpu.memory_space<vmem>>, %arg2: memref<384x128xf32, #tpu.memory_space<vmem>>, %arg3: memref<8x128xf32, #tpu.memory_space<vmem>>, %arg4: memref<8x128xf32, #tpu.memory_space<vmem>>) attributes {dimension_semantics = [#tpu.dimension_semantics<parallel>], iteration_bounds = array<i64: 1>, scalar_prefetch = 0 : i64, scratch_operands = 0 : i64, tpu.core_type = #tpu.core_type<tc>, window_params = [{transform_indices = @transform_0, window_bounds = array<i64: 8, 384>}, {pipeline_mode = #tpu.pipeline_mode<synchronous>, transform_indices = @transform_1, window_bounds = array<i64: 384, 128>}, {pipeline_mode = #tpu.pipeline_mode<synchronous>, transform_indices = @transform_2, window_bounds = array<i64: 8, 128>}, {transform_indices = @transform_3, window_bounds = array<i64: 8, 128>}]} {
    %c0 = arith.constant 0 : index
    %c0_0 = arith.constant 0 : index
    %0 = vector.load %arg1[%c0, %c0_0] : memref<8x384xf32, #tpu.memory_space<vmem>>, vector<8x384xf32>
    %c0_1 = arith.constant 0 : index
    %c0_2 = arith.constant 0 : index
    %1 = vector.load %arg2[%c0_1, %c0_2] : memref<384x128xf32, #tpu.memory_space<vmem>>, vector<384x128xf32>
    %cst = arith.constant dense<0.000000e+00> : vector<8x128xf32>
    %2 = tpu.matmul %0, %1, %cst {dimension_numbers = #tpu.dot_dimension_numbers<[1], [0], [0], [1], [0, 0, 1, 1], [], []>} : vector<8x384xf32>, vector<384x128xf32>, vector<8x128xf32> -> vector<8x128xf32>
    %c0_3 = arith.constant 0 : index
    %c0_4 = arith.constant 0 : index
    %3 = vector.load %arg3[%c0_3, %c0_4] : memref<8x128xf32, #tpu.memory_space<vmem>>, vector<8x128xf32>
    %4 = arith.addf %2, %3 : vector<8x128xf32>
    %c0_5 = arith.constant 0 : index
    %c0_6 = arith.constant 0 : index
    %5 = vector.load %arg4[%c0_5, %c0_6] : memref<8x128xf32, #tpu.memory_space<vmem>>, vector<8x128xf32>
    tpu.vector_store %arg4[%c0_5, %c0_6], %4 {strides = array<i32>} : memref<8x128xf32, #tpu.memory_space<vmem>>, vector<8x128xf32>,
    return
  }
  func.func @transform_0(%arg0: i32) -> (i32, i32) {
    %c0_i32 = arith.constant 0 : i32
    %c0_i32_0 = arith.constant 0 : i32
    return %arg0, %c0_i32 : i32, i32
  }
  func.func @transform_1(%arg0: i32) -> (i32, i32) {
    %c0_i32 = arith.constant 0 : i32
    %c0_i32_0 = arith.constant 0 : i32
    %c0_i32_1 = arith.constant 0 : i32
    return %c0_i32, %c0_i32_0 : i32, i32
  }
  func.func @transform_2(%arg0: i32) -> (i32, i32) {
    %c0_i32 = arith.constant 0 : i32
    %c0_i32_0 = arith.constant 0 : i32
    %c0_i32_1 = arith.constant 0 : i32
    return %c0_i32, %c0_i32_0 : i32, i32
  }
  func.func @transform_3(%arg0: i32) -> (i32, i32) {
    %c0_i32 = arith.constant 0 : i32
    %c0_i32_0 = arith.constant 0 : i32
    return %arg0, %c0_i32 : i32, i32
  }
}

</mosaic_0001>

<bundles_post_ra>
// kernel: tpu_custom_call.1
= control target key start
LH: loop header
LB: loop body
LE: loop exit
PB: predicated region body
PF: predicated region fallthrough
CT: control target
= control target key end

     0   :  { %8 = vsyncpa [#allocation3], 0  ;;  %s592_s0 = inlined_call_operand.hbm [shape: f32[8,384], index: 0, kind: input, shape index: {}]   ;;  %s593_s1 = inlined_call_operand.hbm [shape: f32[384,128], index: 1, kind: input, shape index: {}]   ;;  %s594_s2 = inlined_call_operand.hbm [shape: f32[8,128], index: 2, kind: input, shape index: {}]   ;;  %s595_s3 = inlined_call_operand.hbm [shape: f32[8,128], index: 3, kind: output, shape index: {}]  }
   0x1   :  { %9 = vsyncpa [#allocation6], 0 }
   0x2   :  { %10 = vsyncpa [#allocation4], 0  ;;  %s507_s12 = smov [#allocation5]   ;;  %s413_s16 = scalar_lea.hbm %s593_s1, 6144 }
   0x3   :  { %s26_s13 = sshll.u32 %s507_s12, 4  ;;  %p414_p0 = scmp.ne.s32.totalorder %s593_s1, %s413_s16  ;;  %s27_s13 = int_to_ptr.vmem [resolvable:$true] %s26_s13 }
   0x4   :  { %p417_p1 = scmp.lt.u32.totalorder %s413_s16, %s593_s1 }
   0x6   :  { %p419_p2 = pnand %p417_p1, %p414_p0 }
   0x8   :  { %422 = shalt.err (!%p419_p2)
}
   0x9   :  { %s423_s21 = scalar_lea.vmem %s27_s13, 6144  ;;  %p428_p4 = scmp.lt.s32.totalorder %s27_s13, %s27_s13 }
   0xa   :  { %p424_p3 = scmp.ne.s32.totalorder %s27_s13, %s423_s21  ;;  %p429_p5 = scmp.lt.s32.totalorder %s423_s21, %s423_s21 }
   0xc   :  { %p430_p6 = por %p429_p5, %p428_p4 }
   0xe   :  { %p431_p7 = pnand %p430_p6, %p424_p3 }
  0x10   :  { %434 = shalt.err (!%p431_p7)
}
  0x11   :  { %s508_s22 = smov 128   ;;  %s509_s23 = smov 8  }
  0x12   :  { %32 = dma.hbm_to_vmem [thread:$0]  %s593_s1, 6144, %s27_s13, [#allocation6], %s508_s22, %s508_s22, %s509_s23  }
  0x13   :  { %s510_s26 = smov [#allocation2]   ;;  %s511_s28 = smov [#allocation7]  }
  0x14   :  { %s17_s27 = sshll.u32 %s510_s26, 4  ;;  %s39_s29 = sshll.u32 %s511_s28, 4  ;;  %s18_s27 = int_to_ptr.vmem [resolvable:$true] %s17_s27  ;;  %s40_s29 = int_to_ptr.vmem [resolvable:$true] %s39_s29 }
  0x15   :  { %s435_s5 = scalar_lea.hbm %s592_s0, 384 }
  0x16   :  { %p436_p8 = scmp.ne.s32.totalorder %s592_s0, %s435_s5  ;;  %p439_p9 = scmp.lt.u32.totalorder %s435_s5, %s592_s0 }
  0x18   :  { %p441_p10 = pnand %p439_p9, %p436_p8 }
  0x1a   :  { %444 = shalt.err (!%p441_p10)
}
  0x1b   :  { %s445_s1 = scalar_lea.vmem %s18_s27, 384  ;;  %p450_p12 = scmp.lt.s32.totalorder %s18_s27, %s18_s27 }
  0x1c   :  { %p446_p11 = scmp.ne.s32.totalorder %s18_s27, %s445_s1  ;;  %p451_p13 = scmp.lt.s32.totalorder %s445_s1, %s445_s1 }
  0x1e   :  { %p452_p0 = por %p451_p13, %p450_p12 }
  0x20   :  { %p453_p1 = pnand %p452_p0, %p446_p11 }
  0x22   :  { %456 = shalt.err (!%p453_p1)
}
  0x23   :  { %20 = dma.hbm_to_vmem [thread:$0]  %s592_s0, 384, %s18_s27, [#allocation3]  }
  0x24   :  { %s457_s14 = scalar_lea.hbm %s594_s2, 128 }
  0x25   :  { %p458_p2 = scmp.ne.s32.totalorder %s594_s2, %s457_s14  ;;  %p461_p3 = scmp.lt.u32.totalorder %s457_s14, %s594_s2 }
  0x27   :  { %p463_p4 = pnand %p461_p3, %p458_p2 }
  0x29   :  { %466 = shalt.err (!%p463_p4)
}
  0x2a   :  { %s467_s19 = scalar_lea.vmem %s40_s29, 128  ;;  %p472_p6 = scmp.lt.s32.totalorder %s40_s29, %s40_s29 }
  0x2b   :  { %p468_p5 = scmp.ne.s32.totalorder %s40_s29, %s467_s19  ;;  %p473_p7 = scmp.lt.s32.totalorder %s467_s19, %s467_s19 }
  0x2d   :  { %p474_p8 = por %p473_p7, %p472_p6 }
  0x2f   :  { %p475_p9 = pnand %p474_p8, %p468_p5 }
  0x31   :  { %478 = shalt.err (!%p475_p9)
}
  0x32   :  { %42 = dma.hbm_to_vmem [thread:$0]  %s594_s2, 128, %s40_s29, [#allocation6]  }
  0x33   :  { %501 = dma.done.wait [#allocation3], 384  }
  0x34   :  { %502 = vsyncadd [#allocation3], 4294966912 }
  0x35   :  { %503 = dma.done.wait [#allocation6], 6272  }
  0x36   :  { %504 = vsyncadd [#allocation6], 4294961024  ;;  %v512_v0 = vmov 0.0|0.0   ;;  %vm513_vm0 = vmmov 0   ;;  %v514_v1 = vmov 0.0   ;;  %v71_v2 = vld [vmem:[#allocation5 + $0x80] sm:$0xff] }
  0x37   :  { %380 = vmatprep.subr.bf16.mxu1 %v512_v0  ;;  %345 = vmatprep.mubr.msk.f32.mxu1 %vm513_vm0, %v514_v1  ;;  %v72_v3 = vld [vmem:[#allocation5 + $0x88] sm:$0xff]  ;;  %v55_v4 = vld [vmem:[#allocation5] sm:$0xff]  ;;  %v73_v7 = vld [vmem:[#allocation5 + $0x90] sm:$0xff]  ;;  %s515_s2 = smov [#allocation8]  }
  0x38   :  { %v348_v5 = vpack.c.bf16 %v72_v3, %v71_v2  ;;  %v56_v6 = vld [vmem:[#allocation5 + $0x8] sm:$0xff]  ;;  %v74_v8 = vld [vmem:[#allocation5 + $0x98] sm:$0xff]  ;;  %v57_v11 = vld [vmem:[#allocation5 + $0x10] sm:$0xff]  ;;  %s251_s21 = sshll.u32 %s515_s2, 4  ;;  %s252_s21 = int_to_ptr.vmem [resolvable:$true] %s251_s21 }
  0x39   :  { %v350_v9 = vpack.c.bf16 %v56_v6, %v55_v4  ;;  %v352_v10 = vpack.c.bf16 %v74_v8, %v73_v7  ;;  %v58_v12 = vld [vmem:[#allocation5 + $0x18] sm:$0xff]  ;;  %v87_v13 = vld [vmem:[#allocation5 + $0x100] sm:$0xff]  ;;  %v88_v14 = vld [vmem:[#allocation5 + $0x108] sm:$0xff]  ;;  %s479_s22 = scalar_lea.vmem %s252_s21, 128  ;;  %p484_p11 = scmp.lt.s32.totalorder %s252_s21, %s252_s21 }
  0x3a   :  { %349 = vmatprep.subr.bf16.mxu0 %v348_v5  ;;  %v75_v15 = vld [vmem:[#allocation5 + $0xa0] sm:$0xff]  ;;  %v76_v16 = vld [vmem:[#allocation5 + $0xa8] sm:$0xff]  ;;  %v354_v17 = vpack.c.bf16 %v58_v12, %v57_v11  ;;  %v381_v18 = vpack.c.bf16 %v88_v14, %v87_v13  ;;  %v89_v19 = vld [vmem:[#allocation5 + $0x110] sm:$0xff]  ;;  %p480_p10 = scmp.ne.s32.totalorder %s252_s21, %s479_s22  ;;  %p485_p12 = scmp.lt.s32.totalorder %s479_s22, %s479_s22 }
  0x3b   :  { %351 = vmatpush3.bf16.msra.mxu0 %v350_v9  ;;  %v356_v20 = vpack.c.bf16 %v76_v16, %v75_v15  ;;  %v59_v21 = vld [vmem:[#allocation5 + $0x20] sm:$0xff]  ;;  %v60_v22 = vld [vmem:[#allocation5 + $0x28] sm:$0xff]  ;;  %v90_v23 = vld [vmem:[#allocation5 + $0x118] sm:$0xff] }
  0x3c   :  { %353 = vmatprep.subr.bf16.mxu0 %v352_v10  ;;  %382 = vmatpush3.bf16.msra.mxu1 %v381_v18  ;;  %v384_v24 = vpack.c.bf16 %v90_v23, %v89_v19  ;;  %v77_v25 = vld [vmem:[#allocation5 + $0xb0] sm:$0xff]  ;;  %v78_v26 = vld [vmem:[#allocation5 + $0xb8] sm:$0xff]  ;;  %v91_v27 = vld [vmem:[#allocation5 + $0x120] sm:$0xff]  ;;  %v358_v29 = vpack.c.bf16 %v60_v22, %v59_v21  ;;  %p486_p13 = por %p485_p12, %p484_p11 }
  0x3d   :  { %383 = vmatprep.subr.bf16.mxu1 %v512_v0  ;;  %v92_v28 = vld [vmem:[#allocation5 + $0x128] sm:$0xff]  ;;  %v360_v30 = vpack.c.bf16 %v78_v26, %v77_v25  ;;  %v61_v31 = vld [vmem:[#allocation5 + $0x30] sm:$0xff]  ;;  %v62_v32 = vld [vmem:[#allocation5 + $0x38] sm:$0xff] }
  0x3e   :  { %v387_v33 = vpack.c.bf16 %v92_v28, %v91_v27  ;;  %v79_v34 = vld [vmem:[#allocation5 + $0xc0] sm:$0xff]  ;;  %v80_v35 = vld [vmem:[#allocation5 + $0xc8] sm:$0xff]  ;;  %v93_v36 = vld [vmem:[#allocation5 + $0x130] sm:$0xff]  ;;  %v362_v38 = vpack.c.bf16 %v62_v32, %v61_v31  ;;  %p487_p0 = pnand %p486_p13, %p480_p10 }
  0x3f   :  { %355 = vmatpush3.bf16.msra.mxu0 %v354_v17  ;;  %v94_v37 = vld [vmem:[#allocation5 + $0x138] sm:$0xff]  ;;  %v364_v39 = vpack.c.bf16 %v80_v35, %v79_v34  ;;  %v63_v40 = vld [vmem:[#allocation5 + $0x40] sm:$0xff]  ;;  %v64_v41 = vld [vmem:[#allocation5 + $0x48] sm:$0xff] }
  0x40   :  { %357 = vmatprep.subr.bf16.mxu0 %v356_v20  ;;  %385 = vmatpush3.bf16.msra.mxu1 %v384_v24  ;;  %v390_v42 = vpack.c.bf16 %v94_v37, %v93_v36  ;;  %v81_v43 = vld [vmem:[#allocation5 + $0xd0] sm:$0xff]  ;;  %v82_v44 = vld [vmem:[#allocation5 + $0xd8] sm:$0xff]  ;;  %v95_v45 = vld [vmem:[#allocation5 + $0x140] sm:$0xff]  ;;  %v366_v48 = vpack.c.bf16 %v64_v41, %v63_v40 }
  0x41   :  { %386 = vmatprep.subr.bf16.mxu1 %v512_v0  ;;  %v96_v46 = vld [vmem:[#allocation5 + $0x148] sm:$0xff]  ;;  %v53_v47 = vld [vmem:[#allocation2 + $0x8] sm:$0xff]  ;;  %v368_v49 = vpack.c.bf16 %v82_v44, %v81_v43  ;;  %v66_v51 = vld [vmem:[#allocation5 + $0x58] sm:$0xff] }
  0x42   :  { %168 = vmatprep.mubr.f32.mxu0 %v53_v47  ;;  %v65_v50 = vld [vmem:[#allocation5 + $0x50] sm:$0xff]  ;;  %v393_v52 = vpack.c.bf16 %v96_v46, %v95_v45  ;;  %v83_v53 = vld [vmem:[#allocation5 + $0xe0] sm:$0xff]  ;;  %v84_v54 = vld [vmem:[#allocation5 + $0xe8] sm:$0xff] }
  0x43   :  { %359 = vmatpush3.bf16.msra.mxu0 %v358_v29  ;;  %v97_v55 = vld [vmem:[#allocation5 + $0x150] sm:$0xff]  ;;  %v98_v56 = vld [vmem:[#allocation5 + $0x158] sm:$0xff]  ;;  %v370_v57 = vpack.c.bf16 %v66_v51, %v65_v50  ;;  %v372_v58 = vpack.c.bf16 %v84_v54, %v83_v53  ;;  %v67_v59 = vld [vmem:[#allocation5 + $0x60] sm:$0xff] }
  0x44   :  { %361 = vmatprep.subr.bf16.mxu0 %v360_v30  ;;  %388 = vmatpush3.bf16.msra.mxu1 %v387_v33  ;;  %v68_v60 = vld [vmem:[#allocation5 + $0x68] sm:$0xff]  ;;  %v396_v61 = vpack.c.bf16 %v98_v56, %v97_v55  ;;  %v85_v62 = vld [vmem:[#allocation5 + $0xf0] sm:$0xff]  ;;  %v86_v63 = vld [vmem:[#allocation5 + $0xf8] sm:$0xff] }
  0x45   :  { %389 = vmatprep.subr.bf16.mxu1 %v512_v0  ;;  %v99_v1 = vld [vmem:[#allocation5 + $0x160] sm:$0xff]  ;;  %v100_v2 = vld [vmem:[#allocation5 + $0x168] sm:$0xff]  ;;  %v374_v3 = vpack.c.bf16 %v68_v60, %v67_v59  ;;  %v376_v4 = vpack.c.bf16 %v86_v63, %v85_v62  ;;  %v69_v5 = vld [vmem:[#allocation5 + $0x70] sm:$0xff] }
  0x46   :  { %v70_v6 = vld [vmem:[#allocation5 + $0x78] sm:$0xff]  ;;  %v399_v7 = vpack.c.bf16 %v100_v2, %v99_v1  ;;  %v101_v8 = vld [vmem:[#allocation5 + $0x170] sm:$0xff]  ;;  %v52_v12 = vld [vmem:[#allocation2] sm:$0xff] }
  0x47   :  { %363 = vmatpush3.bf16.msra.mxu0 %v362_v38  ;;  %v102_v9 = vld [vmem:[#allocation5 + $0x178] sm:$0xff]  ;;  %v378_v10 = vpack.c.bf16 %v70_v6, %v69_v5  ;;  %v103_v16 = vld [vmem:[#allocation7] sm:$0xff] }
  0x48   :  { %365 = vmatprep.subr.bf16.mxu0 %v364_v39  ;;  %391 = vmatpush3.bf16.msra.mxu1 %v390_v42  ;;  %v402_v11 = vpack.c.bf16 %v102_v9, %v101_v8  ;;  %v54_v13 = vld [vmem:[#allocation2 + $0x10] sm:$0xff] }
  0x49   :  { %392 = vmatprep.subr.bf16.mxu1 %v512_v0 }
  0x4b   :  { %367 = vmatpush3.bf16.msra.mxu0 %v366_v48 }
  0x4c   :  { %369 = vmatprep.subr.bf16.mxu0 %v368_v49  ;;  %394 = vmatpush3.bf16.msra.mxu1 %v393_v52 }
  0x4d   :  { %395 = vmatprep.subr.bf16.mxu1 %v512_v0 }
  0x4f   :  { %371 = vmatpush3.bf16.msra.mxu0 %v370_v57 }
  0x50   :  { %373 = vmatprep.subr.bf16.mxu0 %v372_v58  ;;  %397 = vmatpush3.bf16.msra.mxu1 %v396_v61 }
  0x51   :  { %398 = vmatprep.subr.bf16.mxu1 %v512_v0 }
  0x53   :  { %375 = vmatpush3.bf16.msra.mxu0 %v374_v3 }
  0x54   :  { %377 = vmatprep.subr.bf16.mxu0 %v376_v4  ;;  %400 = vmatpush3.bf16.msra.mxu1 %v399_v7 }
  0x55   :  { %401 = vmatprep.subr.bf16.mxu1 %v512_v0 }
  0x57   :  { %379 = vmatpush3.bf16.msra.mxu0 %v378_v10 }
  0x58   :  { %403 = vmatpush3.bf16.msra.mxu1 %v402_v11 }
  0x5a   :  { %169 = vmatmul.mubr.f32.vlgmr.msra.gmra.mrb[0].mxu0 %v52_v12 }
  0x5b   :  { %346 = vmatmul.mubr.f32.vlgmr.msra.gmra.mrb[0].mxu1 %v54_v13 }
 0x12d   :  { %v293_v14 = vpop.f32.mrb[0].mxu0 }
 0x12e   :  { %v294_v15 = vpop.f32.mrb[1].mxu0  ;;  %v240_v18 = vpop.f32.mrb[0].mxu1 }
 0x12f   :  { %v295_v17 = vadd.f32 %v294_v15, %v293_v14  ;;  %v347_v19 = vpop.f32.mrb[1].mxu1 }
 0x131   :  { %v171_v20 = vadd.f32 %v295_v17, %v103_v16 }
 0x133   :  { %v241_v21 = vadd.f32 %v240_v18, %v171_v20 }
 0x135   :  { %244 = vst [vmem:[#allocation8] sm:$0xff] %v241_v21 }
 0x136   :  { %490 = shalt.err (!%p487_p0)
}
 0x137   :  { %s491_s25 = scalar_lea.hbm %s595_s3, 128 }
 0x138   :  { %p492_p1 = scmp.ne.s32.totalorder %s595_s3, %s491_s25  ;;  %p495_p2 = scmp.lt.u32.totalorder %s491_s25, %s595_s3 }
 0x13a   :  { %p497_p3 = pnand %p495_p2, %p492_p1 }
 0x13c   :  { %500 = shalt.err (!%p497_p3)
}
 0x13d   :  { %254 = dma.vmem_to_hbm [thread:$0]  %s252_s21, 128, %s595_s3, [#allocation4]  }
 0x13e   :  { %505 = dma.done.wait [#allocation4], 128  }
 0x13f   :  { %506 = vsyncadd [#allocation4], 4294967168 }
 0x140   :  { %258 = vsyncpa [#allocation3], 1 }
 0x141   :  { %259 = vsyncpa [#allocation6], 1 }
 0x142   :  { %260 = vsyncpa [#allocation4], 1 }

</bundles_post_ra>
